<compile_context>
chip_gen: v6e
topology: v6e:2x2x1
jax: 0.10.0
libtpu: 0.0.40
codegen_flags: <defaults>
</compile_context>

<pallas_src>
import math
import jax
import jax.numpy as jnp
from jax.experimental import pallas as pl
from jax.experimental.pallas import tpu as pltpu

# ---- model hyper-parameters (small, consistent with the module) -------------
D_MODEL = 32
NHEAD = 4
DIM_FF = 64
HEAD_DIM = D_MODEL // NHEAD
SEQ = 8
BATCH = 2
EPS = 1e-5

# Packed small-parameter table layout: one vector per row of a (16, 64) array.
VEC_ROWS = 16
VEC_W = max(DIM_FF, 2 * D_MODEL)  # 64
(ROW_B_QK, ROW_B_V, ROW_B_O, ROW_B1, ROW_B2,
 ROW_G1, ROW_BE1, ROW_G2, ROW_BE2) = range(9)


def _layernorm(x, gamma, beta):
    # x: (R, E), gamma/beta: (1, E). Population variance, matching nn.LayerNorm.
    mean = jnp.mean(x, axis=-1, keepdims=True)
    xc = x - mean
    var = jnp.mean(xc * xc, axis=-1, keepdims=True)
    return xc * jax.lax.rsqrt(var + EPS) * gamma + beta


def encoder_layer_kernel(
    src_ref, pos_ref,              # (L, E) each (batch dim squeezed by BlockSpec)
    wqk_ref,                       # (E, 2E)  bf16, pre-transposed [Wq | Wk]
    wv_ref,                        # (E, E)   bf16, pre-transposed Wv
    wo_ref,                        # (E, E)   bf16, pre-transposed out_proj weight
    w1_ref,                        # (E, F)   bf16, pre-transposed linear1
    w2_ref,                        # (F, E)   bf16, pre-transposed linear2
    vp_ref,                        # (16, 64) f32 packed biases + LayerNorm params
    o_ref,                         # (L, E)
):
    src = src_ref[...]                           # (L, E) f32
    x_qk = src + pos_ref[...]                    # q = k = with_pos_embed(src, pos)

    # ---- packed small parameters (static row slices, all f32) ----------------
    b_qk = vp_ref[ROW_B_QK:ROW_B_QK + 1, : 2 * D_MODEL]   # (1, 2E)
    b_v  = vp_ref[ROW_B_V:ROW_B_V + 1, :D_MODEL]          # (1, E)
    b_o  = vp_ref[ROW_B_O:ROW_B_O + 1, :D_MODEL]
    b1   = vp_ref[ROW_B1:ROW_B1 + 1, :DIM_FF]
    b2   = vp_ref[ROW_B2:ROW_B2 + 1, :D_MODEL]
    g1   = vp_ref[ROW_G1:ROW_G1 + 1, :D_MODEL]
    be1  = vp_ref[ROW_BE1:ROW_BE1 + 1, :D_MODEL]
    g2   = vp_ref[ROW_G2:ROW_G2 + 1, :D_MODEL]
    be2  = vp_ref[ROW_BE2:ROW_BE2 + 1, :D_MODEL]

    # ---- fused Q/K projection + separate V projection (bf16 MXU, f32 acc) ----
    qk = jnp.dot(x_qk.astype(jnp.bfloat16), wqk_ref[...],
                 preferred_element_type=jnp.float32) + b_qk        # (L, 2E) f32
    v = jnp.dot(src.astype(jnp.bfloat16), wv_ref[...],
                preferred_element_type=jnp.float32) + b_v          # (L, E)  f32

    q = qk[:, :D_MODEL] * (1.0 / math.sqrt(HEAD_DIM))              # scaled q (f32)
    k = qk[:, D_MODEL:]

    q_bf = q.astype(jnp.bfloat16)
    k_bf = k.astype(jnp.bfloat16)
    v_bf = v.astype(jnp.bfloat16)

    # ---- multi-head attention: per-head ctx only, single fused out-proj ------
    ctx_heads = []
    for h in range(NHEAD):                        # static, unrolled
        sl = slice(h * HEAD_DIM, (h + 1) * HEAD_DIM)
        # q_h @ k_h^T without an explicit in-kernel transpose.
        s = jax.lax.dot_general(
            q_bf[:, sl], k_bf[:, sl],
            dimension_numbers=(((1,), (1,)), ((), ())),
            preferred_element_type=jnp.float32,
        )                                         # (L, L) f32
        s = s - jnp.max(s, axis=-1, keepdims=True)
        p = jnp.exp(s)
        p = p * pl.reciprocal(jnp.sum(p, axis=-1, keepdims=True), approx=True)
        ctx_heads.append(
            jnp.dot(p.astype(jnp.bfloat16), v_bf[:, sl],
                    preferred_element_type=jnp.float32))            # (L, Dh) f32
    ctx = jnp.concatenate(ctx_heads, axis=-1)     # (L, E): cheap lane writes
    attn = jnp.dot(ctx.astype(jnp.bfloat16), wo_ref[...],
                   preferred_element_type=jnp.float32) + b_o        # (L, E) f32

    # ---- residual + LayerNorm 1 (dropout1 = identity) -------------------------
    x1 = _layernorm(src + attn, g1, be1)

    # ---- feed-forward: linear2(relu(linear1(x))) (dropout = identity) ---------
    h1 = jnp.maximum(
        jnp.dot(x1.astype(jnp.bfloat16), w1_ref[...],
                preferred_element_type=jnp.float32) + b1, 0.0)       # (L, F) f32
    h2 = jnp.dot(h1.astype(jnp.bfloat16), w2_ref[...],
                 preferred_element_type=jnp.float32) + b2            # (L, E) f32

    # ---- residual + LayerNorm 2 (dropout2 = identity) --------------------------
    o_ref[...] = _layernorm(x1 + h2, g2, be2).astype(o_ref.dtype)


def transformer_encoder_layer(src_nle, pos_nle, packed):
    """src_nle, pos_nle: (N, L, E) float32. Returns (N, L, E) float32."""
    N, L, E = src_nle.shape

    def per_batch(shape):
        # (None, L, E): batch dim squeezed out of the kernel ref.
        return pl.BlockSpec((None,) + shape, lambda b: (b, 0, 0))

    def resident(shape):
        return pl.BlockSpec(shape, lambda b: (0, 0))

    grid_spec = pltpu.PrefetchScalarGridSpec(
        num_scalar_prefetch=0,
        grid=(N,),                       # one example per step -> no attn mask;
        in_specs=[                       # "parallel" -> both v7x TCs used.
            per_batch((L, E)),           # src
            per_batch((L, E)),           # pos
            resident((E, 2 * E)),        # W_qk  (bf16, pre-transposed)
            resident((E, E)),            # W_v   (bf16, pre-transposed)
            resident((E, E)),            # W_out (bf16, pre-transposed)
            resident((E, DIM_FF)),       # W1    (bf16, pre-transposed)
            resident((DIM_FF, E)),       # W2    (bf16, pre-transposed)
            resident((VEC_ROWS, VEC_W)), # packed biases / LN params (f32)
        ],
        out_specs=per_batch((L, E)),
    )

    return pl.pallas_call(
        encoder_layer_kernel,
        out_shape=jax.ShapeDtypeStruct((N, L, E), jnp.float32),
        grid_spec=grid_spec,
        compiler_params=pltpu.CompilerParams(
            dimension_semantics=("parallel",)),
    )(
        src_nle, pos_nle,
        packed["w_qk"], packed["w_v"], packed["w_out"],
        packed["w1"], packed["w2"], packed["vec"],
    )


def init_params(key):
    """Parameters in the native PyTorch layout."""
    ks = jax.random.split(key, 8)
    s = 0.05
    return {
        "in_proj_w": s * jax.random.normal(ks[0], (3 * D_MODEL, D_MODEL), jnp.float32),
        "in_proj_b": s * jax.random.normal(ks[1], (3 * D_MODEL,), jnp.float32),
        "out_proj_w": s * jax.random.normal(ks[2], (D_MODEL, D_MODEL), jnp.float32),
        "out_proj_b": s * jax.random.normal(ks[3], (D_MODEL,), jnp.float32),
        "w1": s * jax.random.normal(ks[4], (DIM_FF, D_MODEL), jnp.float32),
        "b1": s * jax.random.normal(ks[5], (DIM_FF,), jnp.float32),
        "w2": s * jax.random.normal(ks[6], (D_MODEL, DIM_FF), jnp.float32),
        "b2": s * jax.random.normal(ks[7], (D_MODEL,), jnp.float32),
        "g1": jnp.ones((D_MODEL,), jnp.float32),
        "be1": jnp.zeros((D_MODEL,), jnp.float32),
        "g2": jnp.ones((D_MODEL,), jnp.float32),
        "be2": jnp.zeros((D_MODEL,), jnp.float32),
    }


def pack_params(p):
    """Host-side, one-time: pre-transpose weights for x @ W, cast weights to bf16
    (MXU-native), and pack the small f32 vectors into one (16, 64) table."""
    w_in_t = p["in_proj_w"].T                 # (E, 3E): cols [q | k | v]
    vec = jnp.zeros((VEC_ROWS, VEC_W), jnp.float32)
    vec = vec.at[ROW_B_QK, : 2 * D_MODEL].set(p["in_proj_b"][: 2 * D_MODEL])
    vec = vec.at[ROW_B_V, :D_MODEL].set(p["in_proj_b"][2 * D_MODEL:])
    vec = vec.at[ROW_B_O, :D_MODEL].set(p["out_proj_b"])
    vec = vec.at[ROW_B1, :DIM_FF].set(p["b1"])
    vec = vec.at[ROW_B2, :D_MODEL].set(p["b2"])
    vec = vec.at[ROW_G1, :D_MODEL].set(p["g1"])
    vec = vec.at[ROW_BE1, :D_MODEL].set(p["be1"])
    vec = vec.at[ROW_G2, :D_MODEL].set(p["g2"])
    vec = vec.at[ROW_BE2, :D_MODEL].set(p["be2"])
    return {
        "w_qk": w_in_t[:, : 2 * D_MODEL].astype(jnp.bfloat16),   # (E, 2E)
        "w_v": w_in_t[:, 2 * D_MODEL:].astype(jnp.bfloat16),     # (E, E)
        "w_out": p["out_proj_w"].T.astype(jnp.bfloat16),         # (E, E)
        "w1": p["w1"].T.astype(jnp.bfloat16),                    # (E, F)
        "w2": p["w2"].T.astype(jnp.bfloat16),                    # (F, E)
        "vec": vec,                                              # (16, 64) f32
    }


if __name__ == "__main__":
    key = jax.random.PRNGKey(0)
    k_src, k_pos, k_par = jax.random.split(key, 3)

    # PyTorch convention is (L, N, E); kernel layout is (N, L, E).
    src_lne = jax.random.normal(k_src, (SEQ, BATCH, D_MODEL), jnp.float32)
    pos_lne = jax.random.normal(k_pos, (SEQ, BATCH, D_MODEL), jnp.float32)

    src_nle = jnp.transpose(src_lne, (1, 0, 2))
    pos_nle = jnp.transpose(pos_lne, (1, 0, 2))

    params = init_params(k_par)
    packed = pack_params(params)

    out_nle = transformer_encoder_layer(src_nle, pos_nle, packed)
    out_lne = jnp.transpose(out_nle, (1, 0, 2))   # back to (L, N, E)
    jax.block_until_ready(out_lne)

    assert out_lne.shape == (SEQ, BATCH, D_MODEL)
    assert bool(jnp.all(jnp.isfinite(out_lne)))
    print("KERNEL_OK")
</pallas_src>

<mosaic_0001>
module attributes {stable_mosaic.version = 11 : i64} {
  func.func @encoder_layer_kernel(%arg0: i32, %arg1: memref<1x8x32xf32, #tpu.memory_space<vmem>>, %arg2: memref<1x8x32xf32, #tpu.memory_space<vmem>>, %arg3: memref<32x64xbf16, #tpu.memory_space<vmem>>, %arg4: memref<32x32xbf16, #tpu.memory_space<vmem>>, %arg5: memref<32x32xbf16, #tpu.memory_space<vmem>>, %arg6: memref<32x64xbf16, #tpu.memory_space<vmem>>, %arg7: memref<64x32xbf16, #tpu.memory_space<vmem>>, %arg8: memref<16x64xf32, #tpu.memory_space<vmem>>, %arg9: memref<1x8x32xf32, #tpu.memory_space<vmem>>) attributes {dimension_semantics = [#tpu.dimension_semantics<parallel>], iteration_bounds = array<i64: 2>, scalar_prefetch = 0 : i64, scratch_operands = 0 : i64, tpu.core_type = #tpu.core_type<tc>, window_params = [{transform_indices = @transform_0, window_bounds = array<i64: 1, 8, 32>}, {transform_indices = @transform_1, window_bounds = array<i64: 1, 8, 32>}, {pipeline_mode = #tpu.pipeline_mode<synchronous>, transform_indices = @transform_2, window_bounds = array<i64: 32, 64>}, {pipeline_mode = #tpu.pipeline_mode<synchronous>, transform_indices = @transform_3, window_bounds = array<i64: 32, 32>}, {pipeline_mode = #tpu.pipeline_mode<synchronous>, transform_indices = @transform_4, window_bounds = array<i64: 32, 32>}, {pipeline_mode = #tpu.pipeline_mode<synchronous>, transform_indices = @transform_5, window_bounds = array<i64: 32, 64>}, {pipeline_mode = #tpu.pipeline_mode<synchronous>, transform_indices = @transform_6, window_bounds = array<i64: 64, 32>}, {pipeline_mode = #tpu.pipeline_mode<synchronous>, transform_indices = @transform_7, window_bounds = array<i64: 16, 64>}, {transform_indices = @transform_8, window_bounds = array<i64: 1, 8, 32>}]} {
    %c0 = arith.constant 0 : index
    %c0_0 = arith.constant 0 : index
    %c0_1 = arith.constant 0 : index
    %0 = vector.load %arg1[%c0, %c0_0, %c0_1] : memref<1x8x32xf32, #tpu.memory_space<vmem>>, vector<1x8x32xf32>
    %1 = vector.shape_cast %0 : vector<1x8x32xf32> to vector<8x32xf32>
    %c0_2 = arith.constant 0 : index
    %c0_3 = arith.constant 0 : index
    %c0_4 = arith.constant 0 : index
    %2 = vector.load %arg2[%c0_2, %c0_3, %c0_4] : memref<1x8x32xf32, #tpu.memory_space<vmem>>, vector<1x8x32xf32>
    %3 = vector.shape_cast %2 : vector<1x8x32xf32> to vector<8x32xf32>
    %4 = arith.addf %1, %3 : vector<8x32xf32>
    %c0_5 = arith.constant 0 : index
    %c0_6 = arith.constant 0 : index
    %5 = vector.load %arg8[%c0_5, %c0_6] : memref<16x64xf32, #tpu.memory_space<vmem>>, vector<1x64xf32>
    %c1 = arith.constant 1 : index
    %c0_7 = arith.constant 0 : index
    %6 = vector.load %arg8[%c1, %c0_7] : memref<16x64xf32, #tpu.memory_space<vmem>>, vector<1x32xf32>
    %c2 = arith.constant 2 : index
    %c0_8 = arith.constant 0 : index
    %7 = vector.load %arg8[%c2, %c0_8] : memref<16x64xf32, #tpu.memory_space<vmem>>, vector<1x32xf32>
    %c3 = arith.constant 3 : index
    %c0_9 = arith.constant 0 : index
    %8 = vector.load %arg8[%c3, %c0_9] : memref<16x64xf32, #tpu.memory_space<vmem>>, vector<1x64xf32>
    %c4 = arith.constant 4 : index
    %c0_10 = arith.constant 0 : index
    %9 = vector.load %arg8[%c4, %c0_10] : memref<16x64xf32, #tpu.memory_space<vmem>>, vector<1x32xf32>
    %c5 = arith.constant 5 : index
    %c0_11 = arith.constant 0 : index
    %10 = vector.load %arg8[%c5, %c0_11] : memref<16x64xf32, #tpu.memory_space<vmem>>, vector<1x32xf32>
    %c6 = arith.constant 6 : index
    %c0_12 = arith.constant 0 : index
    %11 = vector.load %arg8[%c6, %c0_12] : memref<16x64xf32, #tpu.memory_space<vmem>>, vector<1x32xf32>
    %c7 = arith.constant 7 : index
    %c0_13 = arith.constant 0 : index
    %12 = vector.load %arg8[%c7, %c0_13] : memref<16x64xf32, #tpu.memory_space<vmem>>, vector<1x32xf32>
    %c8 = arith.constant 8 : index
    %c0_14 = arith.constant 0 : index
    %13 = vector.load %arg8[%c8, %c0_14] : memref<16x64xf32, #tpu.memory_space<vmem>>, vector<1x32xf32>
    %14 = arith.truncf %4 : vector<8x32xf32> to vector<8x32xbf16>
    %c0_15 = arith.constant 0 : index
    %c0_16 = arith.constant 0 : index
    %15 = vector.load %arg3[%c0_15, %c0_16] : memref<32x64xbf16, #tpu.memory_space<vmem>>, vector<32x64xbf16>
    %cst = arith.constant dense<0.000000e+00> : vector<8x64xf32>
    %16 = tpu.matmul %14, %15, %cst {dimension_numbers = #tpu.dot_dimension_numbers<[1], [0], [0], [1], [0, 0, 1, 1], [], []>} : vector<8x32xbf16>, vector<32x64xbf16>, vector<8x64xf32> -> vector<8x64xf32>
    %17 = vector.broadcast %5 : vector<1x64xf32> to vector<8x64xf32>
    %18 = arith.addf %16, %17 : vector<8x64xf32>
    %19 = arith.truncf %1 : vector<8x32xf32> to vector<8x32xbf16>
    %c0_17 = arith.constant 0 : index
    %c0_18 = arith.constant 0 : index
    %20 = vector.load %arg4[%c0_17, %c0_18] : memref<32x32xbf16, #tpu.memory_space<vmem>>, vector<32x32xbf16>
    %cst_19 = arith.constant dense<0.000000e+00> : vector<8x32xf32>
    %21 = tpu.matmul %19, %20, %cst_19 {dimension_numbers = #tpu.dot_dimension_numbers<[1], [0], [0], [1], [0, 0, 1, 1], [], []>} : vector<8x32xbf16>, vector<32x32xbf16>, vector<8x32xf32> -> vector<8x32xf32>
    %22 = vector.broadcast %6 : vector<1x32xf32> to vector<8x32xf32>
    %23 = arith.addf %21, %22 : vector<8x32xf32>
    %24 = vector.extract_strided_slice %18 {offsets = [0, 0], sizes = [8, 32], strides = [1, 1]} : vector<8x64xf32> to vector<8x32xf32>
    %cst_20 = arith.constant 0.353553385 : f32
    %25 = vector.broadcast %cst_20 : f32 to vector<8x32xf32>
    %26 = arith.mulf %24, %25 : vector<8x32xf32>
    %27 = vector.extract_strided_slice %18 {offsets = [0, 32], sizes = [8, 32], strides = [1, 1]} : vector<8x64xf32> to vector<8x32xf32>
    %28 = arith.truncf %26 : vector<8x32xf32> to vector<8x32xbf16>
    %29 = arith.truncf %27 : vector<8x32xf32> to vector<8x32xbf16>
    %30 = arith.truncf %23 : vector<8x32xf32> to vector<8x32xbf16>
    %31 = vector.extract_strided_slice %28 {offsets = [0, 0], sizes = [8, 8], strides = [1, 1]} : vector<8x32xbf16> to vector<8x8xbf16>
    %32 = vector.extract_strided_slice %29 {offsets = [0, 0], sizes = [8, 8], strides = [1, 1]} : vector<8x32xbf16> to vector<8x8xbf16>
    %cst_21 = arith.constant dense<0.000000e+00> : vector<8x8xf32>
    %33 = tpu.matmul %31, %32, %cst_21 {dimension_numbers = #tpu.dot_dimension_numbers<[1], [1], [0], [0], [0, 0, 1, 0], [], []>} : vector<8x8xbf16>, vector<8x8xbf16>, vector<8x8xf32> -> vector<8x8xf32>
    %cst_22 = arith.constant dense<0xFF800000> : vector<8xf32>
    %34 = vector.multi_reduction <maximumf>, %33, %cst_22 [1] : vector<8x8xf32> to vector<8xf32>
    %35 = vector.shape_cast %34 : vector<8xf32> to vector<8x1xf32>
    %36 = vector.broadcast %35 : vector<8x1xf32> to vector<8x8xf32>
    %37 = arith.subf %33, %36 : vector<8x8xf32>
    %38 = math.exp %37 : vector<8x8xf32>
    %cst_23 = arith.constant dense<0.000000e+00> : vector<8xf32>
    %39 = vector.multi_reduction <add>, %38, %cst_23 [1] : vector<8x8xf32> to vector<8xf32>
    %40 = vector.shape_cast %39 : vector<8xf32> to vector<8x1xf32>
    %41 = tpu.reciprocal %40 {approx = true} : vector<8x1xf32> -> vector<8x1xf32>
    %42 = vector.broadcast %41 : vector<8x1xf32> to vector<8x8xf32>
    %43 = arith.mulf %38, %42 : vector<8x8xf32>
    %44 = arith.truncf %43 : vector<8x8xf32> to vector<8x8xbf16>
    %45 = vector.extract_strided_slice %30 {offsets = [0, 0], sizes = [8, 8], strides = [1, 1]} : vector<8x32xbf16> to vector<8x8xbf16>
    %cst_24 = arith.constant dense<0.000000e+00> : vector<8x8xf32>
    %46 = tpu.matmul %44, %45, %cst_24 {dimension_numbers = #tpu.dot_dimension_numbers<[1], [0], [0], [1], [0, 0, 1, 1], [], []>} : vector<8x8xbf16>, vector<8x8xbf16>, vector<8x8xf32> -> vector<8x8xf32>
    %47 = vector.extract_strided_slice %28 {offsets = [0, 8], sizes = [8, 8], strides = [1, 1]} : vector<8x32xbf16> to vector<8x8xbf16>
    %48 = vector.extract_strided_slice %29 {offsets = [0, 8], sizes = [8, 8], strides = [1, 1]} : vector<8x32xbf16> to vector<8x8xbf16>
    %cst_25 = arith.constant dense<0.000000e+00> : vector<8x8xf32>
    %49 = tpu.matmul %47, %48, %cst_25 {dimension_numbers = #tpu.dot_dimension_numbers<[1], [1], [0], [0], [0, 0, 1, 0], [], []>} : vector<8x8xbf16>, vector<8x8xbf16>, vector<8x8xf32> -> vector<8x8xf32>
    %cst_26 = arith.constant dense<0xFF800000> : vector<8xf32>
    %50 = vector.multi_reduction <maximumf>, %49, %cst_26 [1] : vector<8x8xf32> to vector<8xf32>
    %51 = vector.shape_cast %50 : vector<8xf32> to vector<8x1xf32>
    %52 = vector.broadcast %51 : vector<8x1xf32> to vector<8x8xf32>
    %53 = arith.subf %49, %52 : vector<8x8xf32>
    %54 = math.exp %53 : vector<8x8xf32>
    %cst_27 = arith.constant dense<0.000000e+00> : vector<8xf32>
    %55 = vector.multi_reduction <add>, %54, %cst_27 [1] : vector<8x8xf32> to vector<8xf32>
    %56 = vector.shape_cast %55 : vector<8xf32> to vector<8x1xf32>
    %57 = tpu.reciprocal %56 {approx = true} : vector<8x1xf32> -> vector<8x1xf32>
    %58 = vector.broadcast %57 : vector<8x1xf32> to vector<8x8xf32>
    %59 = arith.mulf %54, %58 : vector<8x8xf32>
    %60 = arith.truncf %59 : vector<8x8xf32> to vector<8x8xbf16>
    %61 = vector.extract_strided_slice %30 {offsets = [0, 8], sizes = [8, 8], strides = [1, 1]} : vector<8x32xbf16> to vector<8x8xbf16>
    %cst_28 = arith.constant dense<0.000000e+00> : vector<8x8xf32>
    %62 = tpu.matmul %60, %61, %cst_28 {dimension_numbers = #tpu.dot_dimension_numbers<[1], [0], [0], [1], [0, 0, 1, 1], [], []>} : vector<8x8xbf16>, vector<8x8xbf16>, vector<8x8xf32> -> vector<8x8xf32>
    %63 = vector.extract_strided_slice %28 {offsets = [0, 16], sizes = [8, 8], strides = [1, 1]} : vector<8x32xbf16> to vector<8x8xbf16>
    %64 = vector.extract_strided_slice %29 {offsets = [0, 16], sizes = [8, 8], strides = [1, 1]} : vector<8x32xbf16> to vector<8x8xbf16>
    %cst_29 = arith.constant dense<0.000000e+00> : vector<8x8xf32>
    %65 = tpu.matmul %63, %64, %cst_29 {dimension_numbers = #tpu.dot_dimension_numbers<[1], [1], [0], [0], [0, 0, 1, 0], [], []>} : vector<8x8xbf16>, vector<8x8xbf16>, vector<8x8xf32> -> vector<8x8xf32>
    %cst_30 = arith.constant dense<0xFF800000> : vector<8xf32>
    %66 = vector.multi_reduction <maximumf>, %65, %cst_30 [1] : vector<8x8xf32> to vector<8xf32>
    %67 = vector.shape_cast %66 : vector<8xf32> to vector<8x1xf32>
    %68 = vector.broadcast %67 : vector<8x1xf32> to vector<8x8xf32>
    %69 = arith.subf %65, %68 : vector<8x8xf32>
    %70 = math.exp %69 : vector<8x8xf32>
    %cst_31 = arith.constant dense<0.000000e+00> : vector<8xf32>
    %71 = vector.multi_reduction <add>, %70, %cst_31 [1] : vector<8x8xf32> to vector<8xf32>
    %72 = vector.shape_cast %71 : vector<8xf32> to vector<8x1xf32>
    %73 = tpu.reciprocal %72 {approx = true} : vector<8x1xf32> -> vector<8x1xf32>
    %74 = vector.broadcast %73 : vector<8x1xf32> to vector<8x8xf32>
    %75 = arith.mulf %70, %74 : vector<8x8xf32>
    %76 = arith.truncf %75 : vector<8x8xf32> to vector<8x8xbf16>
    %77 = vector.extract_strided_slice %30 {offsets = [0, 16], sizes = [8, 8], strides = [1, 1]} : vector<8x32xbf16> to vector<8x8xbf16>
    %cst_32 = arith.constant dense<0.000000e+00> : vector<8x8xf32>
    %78 = tpu.matmul %76, %77, %cst_32 {dimension_numbers = #tpu.dot_dimension_numbers<[1], [0], [0], [1], [0, 0, 1, 1], [], []>} : vector<8x8xbf16>, vector<8x8xbf16>, vector<8x8xf32> -> vector<8x8xf32>
    %79 = vector.extract_strided_slice %28 {offsets = [0, 24], sizes = [8, 8], strides = [1, 1]} : vector<8x32xbf16> to vector<8x8xbf16>
    %80 = vector.extract_strided_slice %29 {offsets = [0, 24], sizes = [8, 8], strides = [1, 1]} : vector<8x32xbf16> to vector<8x8xbf16>
    %cst_33 = arith.constant dense<0.000000e+00> : vector<8x8xf32>
    %81 = tpu.matmul %79, %80, %cst_33 {dimension_numbers = #tpu.dot_dimension_numbers<[1], [1], [0], [0], [0, 0, 1, 0], [], []>} : vector<8x8xbf16>, vector<8x8xbf16>, vector<8x8xf32> -> vector<8x8xf32>
    %cst_34 = arith.constant dense<0xFF800000> : vector<8xf32>
    %82 = vector.multi_reduction <maximumf>, %81, %cst_34 [1] : vector<8x8xf32> to vector<8xf32>
    %83 = vector.shape_cast %82 : vector<8xf32> to vector<8x1xf32>
    %84 = vector.broadcast %83 : vector<8x1xf32> to vector<8x8xf32>
    %85 = arith.subf %81, %84 : vector<8x8xf32>
    %86 = math.exp %85 : vector<8x8xf32>
    %cst_35 = arith.constant dense<0.000000e+00> : vector<8xf32>
    %87 = vector.multi_reduction <add>, %86, %cst_35 [1] : vector<8x8xf32> to vector<8xf32>
    %88 = vector.shape_cast %87 : vector<8xf32> to vector<8x1xf32>
    %89 = tpu.reciprocal %88 {approx = true} : vector<8x1xf32> -> vector<8x1xf32>
    %90 = vector.broadcast %89 : vector<8x1xf32> to vector<8x8xf32>
    %91 = arith.mulf %86, %90 : vector<8x8xf32>
    %92 = arith.truncf %91 : vector<8x8xf32> to vector<8x8xbf16>
    %93 = vector.extract_strided_slice %30 {offsets = [0, 24], sizes = [8, 8], strides = [1, 1]} : vector<8x32xbf16> to vector<8x8xbf16>
    %cst_36 = arith.constant dense<0.000000e+00> : vector<8x8xf32>
    %94 = tpu.matmul %92, %93, %cst_36 {dimension_numbers = #tpu.dot_dimension_numbers<[1], [0], [0], [1], [0, 0, 1, 1], [], []>} : vector<8x8xbf16>, vector<8x8xbf16>, vector<8x8xf32> -> vector<8x8xf32>
    %95 = tpu.concatenate %46, %62, %78, %94 in 1 : vector<8x8xf32>, vector<8x8xf32>, vector<8x8xf32>, vector<8x8xf32> -> vector<8x32xf32>
    %96 = arith.truncf %95 : vector<8x32xf32> to vector<8x32xbf16>
    %c0_37 = arith.constant 0 : index
    %c0_38 = arith.constant 0 : index
    %97 = vector.load %arg5[%c0_37, %c0_38] : memref<32x32xbf16, #tpu.memory_space<vmem>>, vector<32x32xbf16>
    %cst_39 = arith.constant dense<0.000000e+00> : vector<8x32xf32>
    %98 = tpu.matmul %96, %97, %cst_39 {dimension_numbers = #tpu.dot_dimension_numbers<[1], [0], [0], [1], [0, 0, 1, 1], [], []>} : vector<8x32xbf16>, vector<32x32xbf16>, vector<8x32xf32> -> vector<8x32xf32>
    %99 = vector.broadcast %7 : vector<1x32xf32> to vector<8x32xf32>
    %100 = arith.addf %98, %99 : vector<8x32xf32>
    %101 = arith.addf %1, %100 : vector<8x32xf32>
    %cst_40 = arith.constant dense<0.000000e+00> : vector<8xf32>
    %102 = vector.multi_reduction <add>, %101, %cst_40 [1] : vector<8x32xf32> to vector<8xf32>
    %103 = vector.shape_cast %102 : vector<8xf32> to vector<8x1xf32>
    %cst_41 = arith.constant 3.200000e+01 : f32
    %104 = vector.broadcast %cst_41 : f32 to vector<8x1xf32>
    %105 = arith.divf %103, %104 : vector<8x1xf32>
    %106 = vector.broadcast %105 : vector<8x1xf32> to vector<8x32xf32>
    %107 = arith.subf %101, %106 : vector<8x32xf32>
    %108 = arith.mulf %107, %107 : vector<8x32xf32>
    %cst_42 = arith.constant dense<0.000000e+00> : vector<8xf32>
    %109 = vector.multi_reduction <add>, %108, %cst_42 [1] : vector<8x32xf32> to vector<8xf32>
    %110 = vector.shape_cast %109 : vector<8xf32> to vector<8x1xf32>
    %cst_43 = arith.constant 3.200000e+01 : f32
    %111 = vector.broadcast %cst_43 : f32 to vector<8x1xf32>
    %112 = arith.divf %110, %111 : vector<8x1xf32>
    %cst_44 = arith.constant 9.99999974E-6 : f32
    %113 = vector.broadcast %cst_44 : f32 to vector<8x1xf32>
    %114 = arith.addf %112, %113 : vector<8x1xf32>
    %115 = math.rsqrt %114 : vector<8x1xf32>
    %116 = vector.broadcast %115 : vector<8x1xf32> to vector<8x32xf32>
    %117 = arith.mulf %107, %116 : vector<8x32xf32>
    %118 = vector.broadcast %10 : vector<1x32xf32> to vector<8x32xf32>
    %119 = arith.mulf %117, %118 : vector<8x32xf32>
    %120 = vector.broadcast %11 : vector<1x32xf32> to vector<8x32xf32>
    %121 = arith.addf %119, %120 : vector<8x32xf32>
    %122 = arith.truncf %121 : vector<8x32xf32> to vector<8x32xbf16>
    %c0_45 = arith.constant 0 : index
    %c0_46 = arith.constant 0 : index
    %123 = vector.load %arg6[%c0_45, %c0_46] : memref<32x64xbf16, #tpu.memory_space<vmem>>, vector<32x64xbf16>
    %cst_47 = arith.constant dense<0.000000e+00> : vector<8x64xf32>
    %124 = tpu.matmul %122, %123, %cst_47 {dimension_numbers = #tpu.dot_dimension_numbers<[1], [0], [0], [1], [0, 0, 1, 1], [], []>} : vector<8x32xbf16>, vector<32x64xbf16>, vector<8x64xf32> -> vector<8x64xf32>
    %125 = vector.broadcast %8 : vector<1x64xf32> to vector<8x64xf32>
    %126 = arith.addf %124, %125 : vector<8x64xf32>
    %cst_48 = arith.constant 0.000000e+00 : f32
    %127 = vector.broadcast %cst_48 : f32 to vector<8x64xf32>
    %128 = arith.maximumf %126, %127 : vector<8x64xf32>
    %129 = arith.truncf %128 : vector<8x64xf32> to vector<8x64xbf16>
    %c0_49 = arith.constant 0 : index
    %c0_50 = arith.constant 0 : index
    %130 = vector.load %arg7[%c0_49, %c0_50] : memref<64x32xbf16, #tpu.memory_space<vmem>>, vector<64x32xbf16>
    %cst_51 = arith.constant dense<0.000000e+00> : vector<8x32xf32>
    %131 = tpu.matmul %129, %130, %cst_51 {dimension_numbers = #tpu.dot_dimension_numbers<[1], [0], [0], [1], [0, 0, 1, 1], [], []>} : vector<8x64xbf16>, vector<64x32xbf16>, vector<8x32xf32> -> vector<8x32xf32>
    %132 = vector.broadcast %9 : vector<1x32xf32> to vector<8x32xf32>
    %133 = arith.addf %131, %132 : vector<8x32xf32>
    %134 = arith.addf %121, %133 : vector<8x32xf32>
    %cst_52 = arith.constant dense<0.000000e+00> : vector<8xf32>
    %135 = vector.multi_reduction <add>, %134, %cst_52 [1] : vector<8x32xf32> to vector<8xf32>
    %136 = vector.shape_cast %135 : vector<8xf32> to vector<8x1xf32>
    %cst_53 = arith.constant 3.200000e+01 : f32
    %137 = vector.broadcast %cst_53 : f32 to vector<8x1xf32>
    %138 = arith.divf %136, %137 : vector<8x1xf32>
    %139 = vector.broadcast %138 : vector<8x1xf32> to vector<8x32xf32>
    %140 = arith.subf %134, %139 : vector<8x32xf32>
    %141 = arith.mulf %140, %140 : vector<8x32xf32>
    %cst_54 = arith.constant dense<0.000000e+00> : vector<8xf32>
    %142 = vector.multi_reduction <add>, %141, %cst_54 [1] : vector<8x32xf32> to vector<8xf32>
    %143 = vector.shape_cast %142 : vector<8xf32> to vector<8x1xf32>
    %cst_55 = arith.constant 3.200000e+01 : f32
    %144 = vector.broadcast %cst_55 : f32 to vector<8x1xf32>
    %145 = arith.divf %143, %144 : vector<8x1xf32>
    %cst_56 = arith.constant 9.99999974E-6 : f32
    %146 = vector.broadcast %cst_56 : f32 to vector<8x1xf32>
    %147 = arith.addf %145, %146 : vector<8x1xf32>
    %148 = math.rsqrt %147 : vector<8x1xf32>
    %149 = vector.broadcast %148 : vector<8x1xf32> to vector<8x32xf32>
    %150 = arith.mulf %140, %149 : vector<8x32xf32>
    %151 = vector.broadcast %12 : vector<1x32xf32> to vector<8x32xf32>
    %152 = arith.mulf %150, %151 : vector<8x32xf32>
    %153 = vector.broadcast %13 : vector<1x32xf32> to vector<8x32xf32>
    %154 = arith.addf %152, %153 : vector<8x32xf32>
    %c0_57 = arith.constant 0 : index
    %c0_58 = arith.constant 0 : index
    %c0_59 = arith.constant 0 : index
    %155 = vector.load %arg9[%c0_57, %c0_58, %c0_59] : memref<1x8x32xf32, #tpu.memory_space<vmem>>, vector<1x8x32xf32>
    %156 = vector.shape_cast %155 : vector<1x8x32xf32> to vector<8x32xf32>
    %157 = vector.shape_cast %154 : vector<8x32xf32> to vector<1x8x32xf32>
    tpu.vector_store %arg9[%c0_57, %c0_58, %c0_59], %157 {strides = array<i32>} : memref<1x8x32xf32, #tpu.memory_space<vmem>>, vector<1x8x32xf32>,
    return
  }
  func.func @transform_0(%arg0: i32) -> (i32, i32, i32) {
    %c0_i32 = arith.constant 0 : i32
    %c0_i32_0 = arith.constant 0 : i32
    %c0_i32_1 = arith.constant 0 : i32
    return %arg0, %c0_i32, %c0_i32_0 : i32, i32, i32
  }
  func.func @transform_1(%arg0: i32) -> (i32, i32, i32) {
    %c0_i32 = arith.constant 0 : i32
    %c0_i32_0 = arith.constant 0 : i32
    %c0_i32_1 = arith.constant 0 : i32
    return %arg0, %c0_i32, %c0_i32_0 : i32, i32, i32
  }
  func.func @transform_2(%arg0: i32) -> (i32, i32) {
    %c0_i32 = arith.constant 0 : i32
    %c0_i32_0 = arith.constant 0 : i32
    %c0_i32_1 = arith.constant 0 : i32
    return %c0_i32, %c0_i32_0 : i32, i32
  }
  func.func @transform_3(%arg0: i32) -> (i32, i32) {
    %c0_i32 = arith.constant 0 : i32
    %c0_i32_0 = arith.constant 0 : i32
    %c0_i32_1 = arith.constant 0 : i32
    return %c0_i32, %c0_i32_0 : i32, i32
  }
  func.func @transform_4(%arg0: i32) -> (i32, i32) {
    %c0_i32 = arith.constant 0 : i32
    %c0_i32_0 = arith.constant 0 : i32
    %c0_i32_1 = arith.constant 0 : i32
    return %c0_i32, %c0_i32_0 : i32, i32
  }
  func.func @transform_5(%arg0: i32) -> (i32, i32) {
    %c0_i32 = arith.constant 0 : i32
    %c0_i32_0 = arith.constant 0 : i32
    %c0_i32_1 = arith.constant 0 : i32
    return %c0_i32, %c0_i32_0 : i32, i32
  }
  func.func @transform_6(%arg0: i32) -> (i32, i32) {
    %c0_i32 = arith.constant 0 : i32
    %c0_i32_0 = arith.constant 0 : i32
    %c0_i32_1 = arith.constant 0 : i32
    return %c0_i32, %c0_i32_0 : i32, i32
  }
  func.func @transform_7(%arg0: i32) -> (i32, i32) {
    %c0_i32 = arith.constant 0 : i32
    %c0_i32_0 = arith.constant 0 : i32
    %c0_i32_1 = arith.constant 0 : i32
    return %c0_i32, %c0_i32_0 : i32, i32
  }
  func.func @transform_8(%arg0: i32) -> (i32, i32, i32) {
    %c0_i32 = arith.constant 0 : i32
    %c0_i32_0 = arith.constant 0 : i32
    %c0_i32_1 = arith.constant 0 : i32
    return %arg0, %c0_i32, %c0_i32_0 : i32, i32, i32
  }
}

</mosaic_0001>

<bundles_post_ra>
// kernel: tpu_custom_call.1
= control target key start
LH: loop header
LB: loop body
LE: loop exit
PB: predicated region body
PF: predicated region fallthrough
CT: control target
= control target key end

     0   :  { %13 = vsyncpa [#allocation3], 0  ;;  %s2178_s0 = inlined_call_operand.vmem [shape: f32[2,8,32], index: 0, kind: input, shape index: {}]   ;;  %s2179_s1 = inlined_call_operand.vmem [shape: f32[2,8,32], index: 1, kind: input, shape index: {}]   ;;  %s2180_s2 = inlined_call_operand.vmem [shape: bf16[32,64], index: 2, kind: input, shape index: {}]   ;;  %s2181_s3 = inlined_call_operand.hbm [shape: bf16[32,32], index: 3, kind: input, shape index: {}]   ;;  %s2182_s4 = inlined_call_operand.hbm [shape: bf16[32,32], index: 4, kind: input, shape index: {}]   ;;  %s2183_s5 = inlined_call_operand.hbm [shape: bf16[32,64], index: 5, kind: input, shape index: {}]   ;;  %s2184_s6 = inlined_call_operand.vmem [shape: bf16[64,32], index: 6, kind: input, shape index: {}]   ;;  %s2185_s7 = inlined_call_operand.hbm [shape: f32[16,64], index: 7, kind: input, shape index: {}]   ;;  %s2186_s8 = inlined_call_operand.hbm [shape: f32[2,8,32], index: 8, kind: output, shape index: {}]  }
   0x1   :  { %14 = vsyncpa [#allocation6], 0 }
   0x2   :  { %15 = vsyncpa [#allocation9], 0 }
   0x3   :  { %16 = vsyncpa [#allocation4], 0 }
   0x4   :  { %18 = vsyncpa [#allocation4 + $0x1], 0  ;;  %s1917_s27 = smov 0   ;;  %s1919_s28 = smov 0  }
   0x5   :  { %s1921_s29 = smov 0   ;;  %s1923_s30 = smov 0  }
   0x6 LB: > { %s1938_s9 = sadd.s32 4294967295, %s1849_s30   ;;  %s1367_s10 = sadd.s32 4294967294, %s1849_s30   ;;  %s1849_s30 = sphi %s1923_s30, %s2204_s30   ;;  %s1845_s29 = sphi %s1921_s29, %s2203_s29   ;;  %s1841_s28 = sphi %s1919_s28, %s2202_s28   ;;  %s1837_s27 = sphi %s1917_s27, %s2201_s27  }
   0x7   : > { %s1942_s11 = sadd.s32 1, %s1849_s30   ;;  %s209_s12 = sadd.s32 1, %s1845_s29 }
   0x8   : > { %s206_s13 = ssub.s32 %s1849_s30, %s1942_s11  ;;  %p219_p0 = scmp.ne.s32.totalorder %s1845_s29, %s1841_s28 }
   0x9   : > { %p207_p1 = scmp.eq.s32.totalorder %s206_s13, 0  ;;  %p220_p2 = scmp.eq.s32.totalorder %s1938_s9, 1 }
   0xa   : > { %p225_p3 = scmp.ne.s32.totalorder %s1841_s28, %s1837_s27  ;;  %p226_p4 = scmp.eq.s32.totalorder %s1367_s10, 1 }
   0xb   : > { %s1953_s14 = scalar_select %p207_p1, %s1845_s29, %s209_s12  }
   0xc   : > { %p1955_p5 = por %p220_p2, %p219_p0  ;;  %p1959_p6 = por %p226_p4, %p225_p3 }
   0xd   : > { %p1368_p7 = scmp.ge.s32.totalorder %s1849_s30, 1  ;;  %p233_p8 = scmp.lt.s32.totalorder %s1849_s30, 3 }
   0xe   : > { %s2189_s15 = scalar_select %p1955_p5, 1, 0 }
   0xf   : > { %s2190_s16 = scalar_select %p1959_p6, 1, 0 }
  0x10   : > { %p2187_p9 = scmp.eq.s32.totalorder %s1938_s9, 0  ;;  %p1966_p10 = pnand %p1368_p7, %p233_p8 }
  0x11   : > { %s1851_s18 = smov [#allocation5]   ;;  %s1852_s21 = smov [#allocation2]  }
  0x12   : > { %p1563_p11 = pneg %p1966_p10  ;;  %s261_s19 = sshll.u32 %s1851_s18, 4  ;;  %s262_s19 = int_to_ptr.vmem [resolvable:$true] %s261_s19 }
  0x13   : > { %s248_s22 = sshll.u32 %s1852_s21, 4  ;;  %s1853_s23 = smov [#allocation7]   ;;  %s249_s22 = int_to_ptr.vmem [resolvable:$true] %s248_s22 }
  0x14   : > { %p1974_p12 = pnand %p2187_p9, %p1563_p11  ;;  %s274_s24 = sshll.u32 %s1853_s23, 4  ;;  %s275_s24 = int_to_ptr.vmem [resolvable:$true] %s274_s24 }
  0x15   : > { %s1684_s25 = scalar_lea.vmem %s262_s19, 256  ;;  %p1692_p3 = scmp.lt.s32.totalorder %s262_s19, %s262_s19 }
  0x16   : > { %p1675_p13 = pneg %p1974_p12  ;;  %p1685_p0 = scmp.ne.s32.totalorder %s262_s19, %s1684_s25 }
  0x17   : > { %p1693_p4 = scmp.lt.s32.totalorder %s1684_s25, %s1684_s25 }
  0x18   : > { %p1687_p1 = pnand %p1685_p0, %p1675_p13 }
  0x19   : > { %p1694_p7 = por %p1693_p4, %p1692_p3 }
  0x1a   : > { %p1688_p2 = pneg %p1687_p1 }
  0x1c   : > { %p1695_p8 = pnand %p1694_p7, %p1688_p2 }
  0x1e   : > { %1698 = shalt.err (!%p1695_p8)
}
  0x1f   : > { %s1854_s26 = smov 64   ;;  %s1855_s10 = smov 4  }
  0x20   : > { %1569 = dma.hbm_to_vmem [thread:$0]  (!%p1974_p12), %s2182_s4, 256, %s262_s19, [#allocation6], %s1854_s26, %s1854_s26, %s1855_s10  }
  0x21   : > { %s1710_s18 = scalar_lea.vmem %s249_s22, 256  ;;  %p1718_p9 = scmp.lt.s32.totalorder %s249_s22, %s249_s22 }
  0x22   : > { %p1711_p11 = scmp.ne.s32.totalorder %s249_s22, %s1710_s18  ;;  %p1719_p6 = scmp.lt.s32.totalorder %s1710_s18, %s1710_s18 }
  0x24   : > { %p1713_p0 = pnand %p1711_p11, %p1675_p13  ;;  %p1720_p3 = por %p1719_p6, %p1718_p9 }
  0x26   : > { %p1714_p1 = pneg %p1713_p0 }
  0x28   : > { %p1721_p2 = pnand %p1720_p3, %p1714_p1 }
  0x2a   : > { %1724 = shalt.err (!%p1721_p2)
}
  0x2b   : > { %1566 = dma.hbm_to_vmem [thread:$0]  (!%p1974_p12), %s2181_s3, 256, %s249_s22, [#allocation3], %s1854_s26, %s1854_s26, %s1855_s10  }
  0x2c   : > { %s1736_s19 = scalar_lea.vmem %s275_s24, 256  ;;  %p1744_p11 = scmp.lt.s32.totalorder %s275_s24, %s275_s24 }
  0x2d   : > { %p1737_p4 = scmp.ne.s32.totalorder %s275_s24, %s1736_s19  ;;  %p1745_p0 = scmp.lt.s32.totalorder %s1736_s19, %s1736_s19 }
  0x2f   : > { %p1739_p7 = pnand %p1737_p4, %p1675_p13  ;;  %p1746_p5 = por %p1745_p0, %p1744_p11 }
  0x31   : > { %p1740_p8 = pneg %p1739_p7 }
  0x33   : > { %p1747_p6 = pnand %p1746_p5, %p1740_p8 }
  0x35   : > { %1750 = shalt.err (!%p1747_p6)
}
  0x36   : > { %1572 = dma.hbm_to_vmem [thread:$0]  (!%p1974_p12), %s2183_s5, 256, %s275_s24, [#allocation6], %s1854_s26, %s1854_s26, %s1855_s10  }
  0x37   : > { %s1856_s22 = smov [#allocation8]  }
  0x38   : > { %s290_s13 = sshll.u32 %s1856_s22, 4  ;;  %s291_s13 = int_to_ptr.vmem [resolvable:$true] %s290_s13 }
  0x39   : > { %s1762_s18 = scalar_lea.vmem %s291_s13, 256  ;;  %p1770_p2 = scmp.lt.s32.totalorder %s291_s13, %s291_s13 }
  0x3a   : > { %p1763_p9 = scmp.ne.s32.totalorder %s291_s13, %s1762_s18  ;;  %p1771_p4 = scmp.lt.s32.totalorder %s1762_s18, %s1762_s18 }
  0x3c   : > { %p1765_p1 = pnand %p1763_p9, %p1675_p13  ;;  %p1772_p5 = por %p1771_p4, %p1770_p2 }
  0x3e   : > { %p1766_p3 = pneg %p1765_p1 }
  0x40   : > { %p1773_p7 = pnand %p1772_p5, %p1766_p3 }
  0x42   : > { %1776 = shalt.err (!%p1773_p7)
}
  0x43   : > { %s1857_s21 = smov 128   ;;  %s1858_s23 = smov 8  }
  0x44   : > { %1575 = dma.hbm_to_vmem [thread:$0]  (!%p1974_p12), %s2185_s7, 256, %s291_s13, [#allocation9], %s1857_s21, %s1857_s21, %s1858_s23  }
  0x45   : > { %320 = sbr.rel (%p1966_p10) target bundleno = 2517 (0x9d5), region = 52  ;;  %p2193_p8 = scmp.eq.s32.totalorder (!%p1966_p10), %s1938_s9, 0 }
  0x4a   : > { %1820 = dma.done.wait (%p2193_p8), [#allocation3], 256   ;;  %p2194_p13 = pmov %p2193_p8 }
  0x4b   : > { %p2195_p11 = pmov %p2193_p8 }
  0x4c   : > { %1822 = vsyncadd (%p2194_p13), [#allocation3], 4294967040 }
  0x4d   : > { %1824 = dma.done.wait (%p2195_p11), [#allocation6], 512   ;;  %p2196_p0 = pmov %p2193_p8 }
  0x4f   : > { %1826 = vsyncadd (%p2196_p0), [#allocation6], 4294966784  ;;  %p2197_p6 = pmov %p2196_p0 }
  0x50   : > { %p2198_p12 = pmov %p2196_p0 }
  0x51   : > { %1828 = dma.done.wait (%p2197_p6), [#allocation9], 256  }
  0x52   : > { %1830 = vsyncadd (%p2198_p12), [#allocation9], 4294967040  ;;  %p369_p10 = scmp.lt.s32.totalorder %s1938_s9, 1  ;;  %v1859_v0 = vmov 0.0   ;;  %vm1860_vm0 = vmmov 0   ;;  %v1641_v1 = vld [vmem:[%s2180_s2 + $0x8] sm:$0xff]  }
  0x53   : > { %1453 = vmatprep.subr.bf16.mxu1 %v1859_v0  ;;  %1457 = vmatprep.mubr.msk.bf16.mxu1 %vm1860_vm0, %v1859_v0  ;;  %v1642_v2 = vld [vmem:[%s2180_s2] sm:$0xff]   ;;  %vm411_vm1 = vcmask 261120   ;;  %v1382_v7 = vld [vmem:[#allocation8] ss:$0 sm:$0xff]  ;;  %s1861_s24 = smov 96   ;;  %s1864_s26 = smov 80  }
  0x54   : > { %s370_s17 = scalar_select %p369_p10, %s1938_s9, 1  ;;  %1469 = vmatprep.subr.bf16.mxu0 %v1859_v0  ;;  %1471 = vmatprep.mubr.msk.bf16.mxu0 %vm1860_vm0, %v1859_v0  ;;  %v1643_v16 = vld [vmem:[#allocation2 + $0x8] sm:$0xff]   ;;  %v1644_v17 = vld [vmem:[#allocation2] sm:$0xff]   ;;  %vm526_vm2 = vcmask 64512   ;;  %v1386_v53 = vld [vmem:[#allocation8 + $0x1] ss:$0 sm:$0xff] }
  0x55   : > { %1454 = vmatpush3.bf16.msra.mxu1 %v1641_v1  ;;  %s1865_s10 = smov 112   ;;  %s1867_s12 = smov 104   ;;  %vm588_vm3 = vcmask 1043456   ;;  %vm977_vm4 = vcmask 130048   ;;  %vm979_vm5 = vcmask 195584   ;;  %vm1172_vm6 = vcmask 523264  }
  0x56   : > { %s1380_s20 = sshll.u32 %s370_s17, 3  ;;  %1455 = vmatprep.subr.bf16.mxu1 %v1859_v0  ;;  %s1862_s17 = smov 120  }
  0x57   : > { %s372_s25 = scalar_lea.vmem %s2178_s0, %s1380_s20  ;;  %s376_s13 = scalar_lea.vmem %s2179_s1, %s1380_s20 }
  0x58   : > { %v2046_v3 = vld [vmem:[%s372_s25] sm:$0xff]  ;;  %s1863_s20 = smov 88   ;;  %s1866_s25 = smov 72  }
  0x59   : > { %v379_v4 = vld [vmem:[%s376_s13] sm:$0xff]  ;;  %1456 = vmatpush3.bf16.msra.mxu1 %v1642_v2  ;;  %v455_v18 = vpack.c.bf16 %v2046_v3, %v2046_v3  ;;  %s1868_s22 = smov 8   ;;  %s1869_s13 = smov 16  }
  0x5a   : > { %v380_v5 = vadd.f32 %v379_v4, %v2046_v3  ;;  %1461 = vmatprep.subr.bf16.mxu1 %v1859_v0  ;;  %s1870_s18 = smov 24   ;;  %p2199_p1 = scmp.ne.s32.totalorder %s2189_s15, 0 }
  0x5c   : > { %v390_v6 = vpack.c.bf16 %v380_v5, %v380_v5 }
  0x5e   : > { %1458 = vmatmul.mubr.msk.bf16.vlgmr.msra.gmra.mxu1 %vm411_vm1, %v390_v6 }
  0x5f   : > { %1465 = vmatprep.mubr.msk.bf16.mxu1 %vm1860_vm0, %v1859_v0  ;;  %1462 = vmatpush3.bf16.msra.mxu1 %v1643_v16 }
  0x60   : > { %1463 = vmatprep.subr.bf16.mxu1 %v1859_v0 }
  0x63   : > { %1464 = vmatpush3.bf16.msra.mxu1 %v1644_v17 }
  0x64   : > { %1475 = vmatprep.subr.bf16.mxu1 %v1859_v0 }
  0x66   : > { %1466 = vmatmul.mubr.msk.bf16.vlgmr.msra.gmra.mxu1 %vm411_vm1, %v455_v18 }
  0x67   : > { %1477 = vmatprep.mubr.msk.bf16.mxu1 %vm1860_vm0, %v1859_v0 }
 0x11e   : > { %v449_v8 = vpop.f32.mrf.mxu1 }
 0x11f   : > { %v450_v9 = vadd.f32 %v1382_v7, %v449_v8 }
 0x120   : > { %v1459_v10 = vpop.f32.mrf.mxu1 }
 0x121   : > { %v519_v11 = vmul.f32 0.35355338, %v450_v9  ;;  %v521_v12 = vpack.c.bf16 %v450_v9, %v450_v9 }
 0x122   : > { %v452_v13 = vpop.f32.mrf.mxu1 }
 0x123   : > { %v520_v14 = vpack.c.bf16 %v519_v11, %v519_v11  ;;  %524 = vrot.lane.b32.xlu0 %v521_v12, %s1861_s24 }
 0x124   : > { %v1460_v15 = vpop.f32.mrf.mxu1 }
 0x125   : > { %633 = vrot.lane.b32.xlu1 %v520_v14, %s1862_s17 }
 0x126   : > { %v513_v50 = vpop.f32.mrf.mxu1 }
 0x127   : > { %635 = vrot.lane.b32.xlu0 %v521_v12, %s1863_s20  ;;  %v514_v55 = vadd.f32 %v1386_v53, %v513_v50  ;;  %s1871_s20 = smov [#allocation10]  }
 0x128   : > { %v1467_v51 = vpop.f32.mrf.mxu1 }
 0x129   : > { %746 = vrot.lane.b32.xlu1 %v521_v12, %s1864_s26  ;;  %v522_v56 = vpack.c.bf16 %v514_v55, %v514_v55  ;;  %v1646_v51 = vld [vmem:[#allocation5] sm:$0xff]   ;;  %s1781_s26 = sshll.u32 %s1871_s20, 4  ;;  %s1782_s26 = int_to_ptr.vmem [resolvable:$false] %s1781_s26 }
 0x12a   : > { %v516_v52 = vpop.f32.mrf.mxu1 }
 0x12b   : > { %744 = vrot.lane.b32.xlu0 %v520_v14, %s1865_s10  ;;  %v590_v57 = vsel %vm588_vm3, %v522_v56, 0 }
 0x12c   : > { %v1468_v54 = vpop.f32.mrf.mxu1  ;;  %1476 = vmatpush3.bf16.msra.mxu1 %v590_v57 }
 0x12d   : > { %856 = vrot.lane.b32.xlu1 %v521_v12, %s1866_s25  ;;  %1487 = vmatprep.subr.bf16.mxu1 %v1859_v0  ;;  %s366_s25 = sand.u32 1, %s1841_s28  }
 0x12e   : > { %s1242_s24 = scalar_lea.sflag [#allocation4], %s366_s25 }
 0x12f   : > { %854 = vrot.lane.b32.xlu0 %v520_v14, %s1867_s12 }
 0x195   : > { %v525_v19 = vpop.permute.xlu0 %524 }
 0x196   : > { %v531_v20 = vsel %vm526_vm2, %v525_v19, 0 }
 0x197   : > { %1470 = vmatpush3.bf16.xpose.msra.mxu0 %v531_v20  ;;  %v634_v22 = vpop.permute.xlu1 %633 }
 0x198   : > { %1481 = vmatprep.subr.bf16.mxu0 %v1859_v0 }
 0x199   : > { %v636_v21 = vpop.permute.xlu0 %635 }
 0x19a   : > { %v641_v23 = vsel %vm526_vm2, %v636_v21, 0 }
 0x19b   : > { %v747_v24 = vpop.permute.xlu1 %746 }
 0x19c   : > { %v752_v25 = vsel %vm526_vm2, %v747_v24, 0 }
 0x19d   : > { %v745_v27 = vpop.permute.xlu0 %744 }
 0x19e   : > { %1472 = vmatmul.mubr.msk.bf16.vlgmr.msra.gmra.mxu0 %vm526_vm2, %v520_v14 }
 0x19f   : > { %1482 = vmatpush3.bf16.xpose.msra.mxu0 %v641_v23  ;;  %1483 = vmatprep.mubr.msk.bf16.mxu0 %vm1860_vm0, %v1859_v0  ;;  %v857_v26 = vpop.permute.xlu1 %856 }
 0x1a0   : > { %1493 = vmatprep.subr.bf16.mxu0 %v1859_v0  ;;  %v862_v28 = vsel %vm526_vm2, %v857_v26, 0 }
 0x1a1   : > { %v855_v29 = vpop.permute.xlu0 %854 }
 0x1a6   : > { %1484 = vmatmul.mubr.msk.bf16.vlgmr.msra.gmra.mxu0 %vm526_vm2, %v634_v22 }
 0x1a7   : > { %1494 = vmatpush3.bf16.xpose.msra.mxu0 %v752_v25  ;;  %1495 = vmatprep.mubr.msk.bf16.mxu0 %vm1860_vm0, %v1859_v0 }
 0x1a8   : > { %1505 = vmatprep.subr.bf16.mxu0 %v1859_v0 }
 0x1ae   : > { %1496 = vmatmul.mubr.msk.bf16.vlgmr.msra.gmra.mxu0 %vm526_vm2, %v745_v27 }
 0x1af   : > { %1506 = vmatpush3.bf16.xpose.msra.mxu0 %v862_v28  ;;  %1507 = vmatprep.mubr.msk.bf16.mxu0 %vm1860_vm0, %v1859_v0 }
 0x1b0   : > { %1517 = vmatprep.subr.bf16.mxu0 %v1859_v0 }
 0x1b6   : > { %1508 = vmatmul.mubr.msk.bf16.vlgmr.msra.gmra.mxu0 %vm526_vm2, %v855_v29 }
 0x1b7   : > { %1521 = vmatprep.mubr.msk.bf16.mxu0 %vm1860_vm0, %v1859_v0 }
 0x25e   : > { %v567_v30 = vpop.f32.mrf.mxu0 }
 0x25f   : > { %v573_v31 = vsel %vm526_vm2, %v567_v30, -inf }
 0x260   : > { %574 = vmax.xlane.f32.xlu1 %v573_v31  ;;  %v1473_v32 = vpop.f32.mrf.mxu0 }
 0x262   : > { %v570_v33 = vpop.f32.mrf.mxu0 }
 0x264   : > { %v1474_v34 = vpop.f32.mrf.mxu0 }
 0x266   : > { %v677_v35 = vpop.f32.mrf.mxu0 }
 0x267   : > { %v683_v36 = vsel %vm526_vm2, %v677_v35, -inf }
 0x268   : > { %684 = vmax.xlane.f32.xlu0 %v683_v36  ;;  %v1485_v37 = vpop.f32.mrf.mxu0 }
 0x26a   : > { %v680_v38 = vpop.f32.mrf.mxu0 }
 0x26c   : > { %v1486_v39 = vpop.f32.mrf.mxu0 }
 0x26e   : > { %v788_v40 = vpop.f32.mrf.mxu0 }
 0x26f   : > { %v794_v41 = vsel %vm526_vm2, %v788_v40, -inf }
 0x270   : > { %795 = vmax.xlane.f32.xlu0 %v794_v41  ;;  %v1497_v42 = vpop.f32.mrf.mxu0  ;;  %v1645_v41 = vld [vmem:[#allocation5 + $0x8] sm:$0xff]  }
 0x271   : > { %1518 = vmatpush3.bf16.msra.mxu0 %v1645_v41 }
 0x272   : > { %v791_v43 = vpop.f32.mrf.mxu0  ;;  %1519 = vmatprep.subr.bf16.mxu0 %v1859_v0 }
 0x274   : > { %v1498_v44 = vpop.f32.mrf.mxu0 }
 0x275   : > { %1520 = vmatpush3.bf16.msra.mxu0 %v1646_v51 }
 0x276   : > { %v898_v45 = vpop.f32.mrf.mxu0  ;;  %1533 = vmatprep.subr.bf16.mxu0 %v1859_v0 }
 0x277   : > { %v904_v46 = vsel %vm526_vm2, %v898_v45, -inf }
 0x278   : > { %905 = vmax.xlane.f32.xlu1 %v904_v46  ;;  %v1509_v47 = vpop.f32.mrf.mxu0 }
 0x27a   : > { %v901_v48 = vpop.f32.mrf.mxu0 }
 0x27c   : > { %v1510_v49 = vpop.f32.mrf.mxu0 }
 0x2e9   : > { %v575_v58 = vpop.xlane.xlu1 %574 }
 0x2ea   : > { %v576_v59 = vsub.f32 %v567_v30, %v575_v58 }
 0x2ec   : > { %v577_v60 = vmul.f32 1.442695, %v576_v59 }
 0x2ee   : > { %1653 = vpow2.f32 %v577_v60 }
 0x2f1   : > { %v685_v61 = vpop.xlane.xlu0 %684 }
 0x2f2   : > { %v686_v62 = vsub.f32 %v677_v35, %v685_v61 }
 0x2f4   : > { %v687_v63 = vmul.f32 1.442695, %v686_v62 }
 0x2f6   : > { %1655 = vpow2.f32 %v687_v63  ;;  %v1398_v63 = vld [vmem:[#allocation8 + $0x2] ss:$0 sm:$0xff] }
 0x2f9   : > { %v796_v1 = vpop.xlane.xlu0 %795 }
 0x2fa   : > { %v797_v2 = vsub.f32 %v788_v40, %v796_v1 }
 0x2fb   : > { %v1654_v4 = vpop.eup %1653 }
 0x2fc   : > { %v798_v5 = vmul.f32 1.442695, %v797_v2  ;;  %v579_v6 = vsel %vm526_vm2, %v1654_v4, 0.0 }
 0x2fd   : > { %580 = vadd.xlane.f32.xlu0 %v579_v6 }
 0x2fe   : > { %1657 = vpow2.f32 %v798_v5 }
 0x301   : > { %v906_v11 = vpop.xlane.xlu1 %905 }
 0x302   : > { %v907_v12 = vsub.f32 %v898_v45, %v906_v11 }
 0x303   : > { %v1656_v7 = vpop.eup %1655 }
 0x304   : > { %v689_v8 = vsel %vm526_vm2, %v1656_v7, 0.0  ;;  %v908_v13 = vmul.f32 1.442695, %v907_v12 }
 0x305   : > { %690 = vadd.xlane.f32.xlu1 %v689_v8 }
 0x306   : > { %1659 = vpow2.f32 %v908_v13 }
 0x30b   : > { %v1658_v9 = vpop.eup %1657 }
 0x30c   : > { %v800_v10 = vsel %vm526_vm2, %v1658_v9, 0.0 }
 0x30d   : > { %801 = vadd.xlane.f32.xlu0 %v800_v10 }
 0x313   : > { %v1660_v14 = vpop.eup %1659 }
 0x314   : > { %v910_v15 = vsel %vm526_vm2, %v1660_v14, 0.0 }
 0x316   : > { %806 = vrot.lane.b32.xlu1 %v522_v56, %s1865_s10 }
 0x323   : > { %696 = vrot.lane.b32.xlu0 %v522_v56, %s1862_s17 }
 0x33a   : > { %911 = vadd.xlane.f32.xlu1 %v910_v15  ;;  %v1648_v15 = vld [vmem:[#allocation7] sm:$0xff]  }
 0x34b   : > { %916 = vrot.lane.b32.xlu1 %v522_v56, %s1867_s12  ;;  %s1379_s12 = sshll.u32 %s366_s25, 3 }
 0x386   : > { %v581_v16 = vpop.xlane.xlu0 %580 }
 0x387   : > { %1661 = vrcp.f32 %v581_v16  ;;  %v1650_v16 = vld [vmem:[%s2184_s6 + $0x10] sm:$0xff]  }
 0x38e   : > { %v691_v17 = vpop.xlane.xlu1 %690 }
 0x38f   : > { %1663 = vrcp.f32 %v691_v17 }
 0x392   : > { %v807_v26 = vpop.permute.xlu1 %806 }
 0x393   : > { %v812_v28 = vsel %vm588_vm3, %v807_v26, 0 }
 0x394   : > { %v1662_v18 = vpop.eup %1661 }
 0x395   : > { %v583_v19 = vmul.f32 %v1662_v18, %v1654_v4 }
 0x396   : > { %v802_v20 = vpop.xlane.xlu0 %801 }
 0x397   : > { %1665 = vrcp.f32 %v802_v20  ;;  %v584_v21 = vpack.c.bf16 %v583_v19, %v583_v19 }
 0x399   : > { %1478 = vmatmul.mubr.msk.bf16.vlgmr.msra.gmra.mxu1 %vm526_vm2, %v584_v21  ;;  %v1402_v21 = vld [vmem:[#allocation8 + $0x5] ss:$0 sm:$0xff] }
 0x39a   : > { %v697_v22 = vpop.permute.xlu0 %696  ;;  %1489 = vmatprep.mubr.msk.bf16.mxu1 %vm1860_vm0, %v1859_v0 }
 0x39b   : > { %v702_v23 = vsel %vm588_vm3, %v697_v22, 0 }
 0x39c   : > { %v1664_v24 = vpop.eup %1663  ;;  %1488 = vmatpush3.bf16.msra.mxu1 %v702_v23  ;;  %v1403_v23 = vld [vmem:[#allocation8 + $0x6] ss:$0 sm:$0xff] }
 0x39d   : > { %1499 = vmatprep.subr.bf16.mxu1 %v1859_v0  ;;  %v693_v25 = vmul.f32 %v1664_v24, %v1656_v7 }
 0x39f   : > { %v694_v27 = vpack.c.bf16 %v693_v25, %v693_v25 }
 0x3a1   : > { %1490 = vmatmul.mubr.msk.bf16.vlgmr.msra.gmra.mxu1 %vm526_vm2, %v694_v27  ;;  %v1651_v27 = vld [vmem:[%s2184_s6 + $0x8] sm:$0xff]  }
 0x3a2   : > { %1500 = vmatpush3.bf16.msra.mxu1 %v812_v28  ;;  %1501 = vmatprep.mubr.msk.bf16.mxu1 %vm1860_vm0, %v1859_v0  ;;  %v1652_v28 = vld [vmem:[%s2184_s6] sm:$0xff]  }
 0x3a3   : > { %1511 = vmatprep.subr.bf16.mxu1 %v1859_v0 }
 0x3a4   : > { %v1666_v29 = vpop.eup %1665 }
 0x3a5   : > { %v804_v30 = vmul.f32 %v1666_v29, %v1658_v9  ;;  %v1404_v29 = vld [vmem:[#allocation8 + $0x3] ss:$0 sm:$0xff] }
 0x3a7   : > { %v805_v31 = vpack.c.bf16 %v804_v30, %v804_v30 }
 0x3a9   : > { %1502 = vmatmul.mubr.msk.bf16.vlgmr.msra.gmra.mxu1 %vm526_vm2, %v805_v31 }
 0x3aa   : > { %1513 = vmatprep.mubr.msk.bf16.mxu1 %vm1860_vm0, %v1859_v0 }
 0x3c3   : > { %v912_v32 = vpop.xlane.xlu1 %911 }
 0x3c4   : > { %1667 = vrcp.f32 %v912_v32 }
 0x3c7   : > { %v917_v33 = vpop.permute.xlu1 %916 }
 0x3c8   : > { %v922_v34 = vsel %vm588_vm3, %v917_v33, 0 }
 0x3c9   : > { %1512 = vmatpush3.bf16.msra.mxu1 %v922_v34 }
 0x3ca   : > { %1525 = vmatprep.subr.bf16.mxu1 %v1859_v0 }
 0x3d1   : > { %v1668_v35 = vpop.eup %1667 }
 0x3d2   : > { %v914_v36 = vmul.f32 %v1668_v35, %v1660_v14  ;;  %v1647_v14 = vld [vmem:[#allocation7 + $0x8] sm:$0xff]  }
 0x3d4   : > { %v915_v37 = vpack.c.bf16 %v914_v36, %v914_v36 }
 0x3d6   : > { %1514 = vmatmul.mubr.msk.bf16.vlgmr.msra.gmra.mxu1 %vm526_vm2, %v915_v37  ;;  %v1408_v37 = vld [vmem:[#allocation8 + $0x4] ss:$0 sm:$0xff] }
 0x3d7   : > { %1529 = vmatprep.mubr.msk.bf16.mxu1 %vm1860_vm0, %v1859_v0  ;;  %1526 = vmatpush3.bf16.msra.mxu1 %v1647_v14 }
 0x3d8   : > { %1527 = vmatprep.subr.bf16.mxu1 %v1859_v0 }
 0x3db   : > { %1528 = vmatpush3.bf16.msra.mxu1 %v1648_v15 }
 0x459   : > { %v626_v38 = vpop.f32.mrf.mxu1 }
 0x45b   : > { %v1479_v39 = vpop.f32.mrf.mxu1 }
 0x45d   : > { %v629_v40 = vpop.f32.mrf.mxu1 }
 0x45f   : > { %v1480_v42 = vpop.f32.mrf.mxu1 }
 0x461   : > { %v738_v43 = vpop.f32.mrf.mxu1 }
 0x462   : > { %965 = vrot.lane.b32.xlu0 %v738_v43, %s1868_s22  ;;  %s1417_s22 = sshll.u32 %s1938_s9, 7  ;;  %s1783_s9 = scalar_lea.vmem %s1782_s26, 256 }
 0x463   : > { %v1491_v44 = vpop.f32.mrf.mxu1  ;;  %s1253_s19 = scalar_lea.hbm %s2186_s8, %s1417_s22 }
 0x465   : > { %v741_v45 = vpop.f32.mrf.mxu1 }
 0x467   : > { %v1492_v46 = vpop.f32.mrf.mxu1 }
 0x469   : > { %v848_v47 = vpop.f32.mrf.mxu1 }
 0x46a   : > { %969 = vrot.lane.b32.xlu1 %v848_v47, %s1869_s13  ;;  %s368_s13 = scalar_lea.vmem [#allocation10], %s1379_s12 }
 0x46b   : > { %v1503_v48 = vpop.f32.mrf.mxu1 }
 0x46d   : > { %v851_v49 = vpop.f32.mrf.mxu1 }
 0x46f   : > { %v1504_v50 = vpop.f32.mrf.mxu1 }
 0x496   : > { %v958_v52 = vpop.f32.mrf.mxu1 }
 0x497   : > { %973 = vrot.lane.b32.xlu0 %v958_v52, %s1870_s18  ;;  %s1255_s18 = sshll.u32 %s368_s13, 4  ;;  %s1256_s18 = int_to_ptr.vmem [resolvable:$true] %s1255_s18 }
 0x498   : > { %v1515_v53 = vpop.f32.mrf.mxu1  ;;  %s1777_s17 = scalar_lea.vmem %s1256_s18, 128  ;;  %p1784_p4 = scmp.lt.s32.totalorder %s1256_s18, %s1782_s26 }
 0x499   : > { %v1414_v53 = vld [vmem:[#allocation8 + $0x7] ss:$0 sm:$0xff]  ;;  %p1778_p9 = scmp.ne.s32.totalorder %s1256_s18, %s1777_s17  ;;  %p1785_p5 = scmp.lt.s32.totalorder %s1783_s9, %s1777_s17 }
 0x49a   : > { %v961_v54 = vpop.f32.mrf.mxu1 }
 0x49b   : > { %p1779_p3 = pnand %p1778_p9, %p2199_p1  ;;  %p1786_p7 = por %p1785_p5, %p1784_p4 }
 0x49c   : > { %v1516_v55 = vpop.f32.mrf.mxu1 }
 0x49d   : > { %v1415_v55 = vld [vmem:[#allocation8 + $0x8] ss:$0 sm:$0xff]  ;;  %p1780_p2 = pneg %p1779_p3 }
 0x49f   : > { %p1787_p8 = pnand %p1786_p7, %p1780_p2 }
 0x4d4   : > { %v966_v56 = vpop.permute.xlu0 %965 }
 0x4d5   : > { %v976_v58 = vsel %vm526_vm2, %v626_v38, %v966_v56 }
 0x4dc   : > { %v970_v57 = vpop.permute.xlu1 %969 }
 0x4dd   : > { %v978_v59 = vsel %vm977_vm4, %v976_v58, %v970_v57 }
 0x509   : > { %v974_v60 = vpop.permute.xlu0 %973 }
 0x50a   : > { %v980_v61 = vsel %vm979_vm5, %v978_v59, %v974_v60 }
 0x50b   : > { %v981_v62 = vpack.c.bf16 %v980_v61, %v980_v61 }
 0x50d   : > { %1522 = vmatmul.mubr.msk.bf16.vlgmr.msra.gmra.mxu0 %vm411_vm1, %v981_v62 }
 0x50e   : > { %1541 = vmatprep.mubr.msk.bf16.mxu0 %vm1860_vm0, %v1859_v0 }
 0x5cd   : > { %v1039_v1 = vpop.f32.mrf.mxu0 }
 0x5ce   : > { %v1040_v2 = vadd.f32 %v1398_v63, %v1039_v1 }
 0x5cf   : > { %v1523_v4 = vpop.f32.mrf.mxu0 }
 0x5d0   : > { %v1045_v5 = vadd.f32 %v1040_v2, %v2046_v3  ;;  %v1649_v3 = vld [vmem:[%s2184_s6 + $0x18] sm:$0xff]  }
 0x5d1   : > { %v1042_v6 = vpop.f32.mrf.mxu0  ;;  %1534 = vmatpush3.bf16.msra.mxu0 %v1649_v3 }
 0x5d2   : > { %v1046_v7 = vsel %vm411_vm1, %v1045_v5, 0.0  ;;  %1535 = vmatprep.subr.bf16.mxu0 %v1859_v0 }
 0x5d3   : > { %1047 = vadd.xlane.f32.xlu1 %v1046_v7  ;;  %v1524_v8 = vpop.f32.mrf.mxu0 }
 0x5d5   : > { %1536 = vmatpush3.bf16.msra.mxu0 %v1650_v16 }
 0x5d6   : > { %1537 = vmatprep.subr.bf16.mxu0 %v1859_v0 }
 0x5d9   : > { %1538 = vmatpush3.bf16.msra.mxu0 %v1651_v27 }
 0x5da   : > { %1539 = vmatprep.subr.bf16.mxu0 %v1859_v0 }
 0x5dd   : > { %1540 = vmatpush3.bf16.msra.mxu0 %v1652_v28 }
 0x65c   : > { %v1048_v9 = vpop.xlane.xlu1 %1047 }
 0x65d   : > { %v1050_v10 = vmul.f32 0.03125, %v1048_v9 }
 0x65f   : > { %v1051_v11 = vsub.f32 %v1045_v5, %v1050_v10 }
 0x661   : > { %v1052_v12 = vmul.f32 %v1051_v11, %v1051_v11 }
 0x663   : > { %v1053_v13 = vsel %vm411_vm1, %v1052_v12, 0.0 }
 0x664   : > { %1054 = vadd.xlane.f32.xlu0 %v1053_v13 }
 0x6ed   : > { %v1055_v17 = vpop.xlane.xlu0 %1054 }
 0x6ee   : > { %v1056_v18 = vmul.f32 0.03125, %v1055_v17 }
 0x6f0   : > { %v1057_v19 = vadd.f32 1e-05, %v1056_v18 }
 0x6f2   : > { %1669 = vrsqrt.f32 %v1057_v19 }
 0x6ff   : > { %v1670_v20 = vpop.eup %1669 }
 0x700   : > { %v1059_v22 = vmul.f32 %v1670_v20, %v1051_v11 }
 0x702   : > { %v1064_v24 = vmul.f32 %v1402_v21, %v1059_v22 }
 0x704   : > { %v1069_v25 = vadd.f32 %v1403_v23, %v1064_v24 }
 0x706   : > { %v1070_v26 = vpack.c.bf16 %v1069_v25, %v1069_v25 }
 0x708   : > { %1530 = vmatmul.mubr.msk.bf16.vlgmr.msra.gmra.mxu1 %vm411_vm1, %v1070_v26 }
 0x7c8   : > { %v1128_v30 = vpop.f32.mrf.mxu1 }
 0x7c9   : > { %v1129_v31 = vadd.f32 %v1404_v29, %v1128_v30 }
 0x7ca   : > { %v1531_v32 = vpop.f32.mrf.mxu1 }
 0x7cb   : > { %v1134_v33 = vmax.f32 %v1129_v31, 0.0 }
 0x7cc   : > { %v1131_v34 = vpop.f32.mrf.mxu1 }
 0x7cd   : > { %v1135_v35 = vpack.c.bf16 %v1134_v33, %v1134_v33 }
 0x7ce   : > { %v1532_v36 = vpop.f32.mrf.mxu1 }
 0x7cf   : > { %1542 = vmatmul.mubr.msk.bf16.vlgmr.msra.gmra.mxu0 %vm1172_vm6, %v1135_v35 }
 0x88f   : > { %v1210_v38 = vpop.f32.mrf.mxu0 }
 0x890   : > { %v1211_v39 = vadd.f32 %v1408_v37, %v1210_v38 }
 0x891   : > { %v1543_v40 = vpop.f32.mrf.mxu0 }
 0x892   : > { %v1216_v0 = vadd.f32 %v1211_v39, %v1069_v25 }
 0x893   : > { %v1213_v41 = vpop.f32.mrf.mxu0 }
 0x894   : > { %v1217_v42 = vsel %vm411_vm1, %v1216_v0, 0.0 }
 0x895   : > { %1218 = vadd.xlane.f32.xlu0 %v1217_v42  ;;  %v1544_v43 = vpop.f32.mrf.mxu0 }
 0x91e   : > { %v1219_v44 = vpop.xlane.xlu0 %1218 }
 0x91f   : > { %v1220_v45 = vmul.f32 0.03125, %v1219_v44 }
 0x921   : > { %v1221_v46 = vsub.f32 %v1216_v0, %v1220_v45 }
 0x923   : > { %v1222_v47 = vmul.f32 %v1221_v46, %v1221_v46 }
 0x925   : > { %v1223_v48 = vsel %vm411_vm1, %v1222_v47, 0.0 }
 0x926   : > { %1224 = vadd.xlane.f32.xlu1 %v1223_v48 }
 0x9af   : > { %v1225_v49 = vpop.xlane.xlu1 %1224 }
 0x9b0   : > { %v1226_v50 = vmul.f32 0.03125, %v1225_v49 }
 0x9b2   : > { %v1227_v51 = vadd.f32 1e-05, %v1226_v50 }
 0x9b4   : > { %1671 = vrsqrt.f32 %v1227_v51 }
 0x9c1   : > { %v1672_v52 = vpop.eup %1671 }
 0x9c2   : > { %v1229_v54 = vmul.f32 %v1672_v52, %v1221_v46 }
 0x9c4   : > { %v1234_v56 = vmul.f32 %v1414_v53, %v1229_v54 }
 0x9c6   : > { %v1239_v57 = vadd.f32 %v1415_v55, %v1234_v56 }
 0x9c8   : > { %1240 = vst.msk [vmem:[%s368_s13] sm:$0xff] %vm411_vm1, %v1239_v57 }
 0x9c9   : > { %1790 = shalt.err (!%p1787_p8)
}
 0x9ca   : > { %s1791_s10 = scalar_lea.hbm %s1253_s19, 128  ;;  %s1795_s22 = scalar_lea.hbm %s2186_s8, 256 }
 0x9cb   : > { %p1792_p13 = scmp.ne.s32.totalorder %s1253_s19, %s1791_s10  ;;  %p1796_p6 = scmp.lt.s32.totalorder %s1253_s19, %s2186_s8 }
 0x9cc   : > { %p1797_p12 = scmp.lt.s32.totalorder %s1795_s22, %s1791_s10 }
 0x9cd   : > { %p1793_p11 = pnand %p1792_p13, %p2199_p1 }
 0x9ce   : > { %p1798_p10 = por %p1797_p12, %p1796_p6 }
 0x9cf   : > { %p1794_p0 = pneg %p1793_p11 }
 0x9d1   : > { %p1799_p9 = pnand %p1798_p10, %p1794_p0 }
 0x9d3   : > { %1802 = shalt.err (!%p1799_p9)
}
 0x9d4   : > { %1561 = dma.vmem_to_hbm [thread:$0]  (%p2199_p1), %s1256_s18, 128, %s1253_s19, %s1242_s24  }
 0x9d5 PF: > { %p1588_p3 = scmp.ge.s32.totalorder %s1849_s30, 2  ;;  %s1267_s23 = sand.u32 1, %s1837_s27  }
 0x9d6   : > { %p2200_p2 = scmp.ne.s32.totalorder %s2190_s16, 0  ;;  %s1268_s17 = scalar_lea.sflag [#allocation4], %s1267_s23 }
 0x9d8   : > { %p1577_p4 = pnand %p1588_p3, %p2200_p2 }
 0x9da   : > { %p1578_p5 = pneg %p1577_p4 }
 0x9dc   : > { %1832 = dma.done.wait (%p1578_p5), %s1268_s17, 128  }
 0x9dd   : > { %1834 = vsyncadd (%p1578_p5), %s1268_s17, 4294967168  ;;  %p21_p7 = scmp.ge.s32.totalorder %s1942_s11, 4   ;;  %s2201_s27 = smov %s1841_s28 }
 0x9de   : > { %s2202_s28 = smov %s1845_s29  ;;  %s2203_s29 = smov %s1953_s14 }
 0x9df   : > { %s2204_s30 = smov %s1942_s11  ;;  %23 = sbr.rel (!%p21_p7) target bundleno = 6 (0x6), region = 107 }
 0x9e4   :  { %1273 = vsyncpa [#allocation3], 1 }
 0x9e5   :  { %1275 = vsyncpa [#allocation3 + $0x1], 1 }
 0x9e6   :  { %1276 = vsyncpa [#allocation6], 1 }
 0x9e7   :  { %1277 = vsyncpa [#allocation9], 1 }
 0x9e8   :  { %1278 = vsyncpa [#allocation4], 1 }
 0x9e9   :  { %1280 = vsyncpa [#allocation4 + $0x1], 1 }

</bundles_post_ra>
